<compile_context>
chip_gen: v6e
topology: v6e:2x2x1
jax: 0.10.0
libtpu: 0.0.40
codegen_flags: <defaults>
</compile_context>

<pallas_src>
import functools

import jax
import jax.numpy as jnp
from jax.experimental import pallas as pl
from jax.experimental.pallas import tpu as pltpu


# ----------------------------- Pallas kernel ------------------------------ #
def _gap_rows_kernel(x_ref, o_ref, *, inv_hw: float):
    # x_ref: (TILE_ROWS, HW) tile in VMEM; o_ref: (1, TILE_ROWS) in VMEM.
    # Accumulate the spatial sum in f32 (works for f32 and bf16 inputs),
    # then scale by the compile-time constant 1/(H*W) (single VPU multiply).
    s = jnp.sum(x_ref[...], axis=-1, dtype=jnp.float32)          # (TILE_ROWS,)
    o_ref[...] = (s * inv_hw).astype(o_ref.dtype)[None, :]       # lane-dense row


def _pick_tile_rows(num_rows: int, bytes_per_row: int) -> int:
    """Choose a row-tile size: ~4 MiB per input buffer, multiple of 8 (or 128)."""
    target_block_bytes = 4 * 1024 * 1024
    rows_cap = ((num_rows + 7) // 8) * 8            # cover all rows, mult of 8
    by_vmem = max(8, target_block_bytes // max(bytes_per_row, 1))
    tile_rows = min(rows_cap, by_vmem, 16384)
    if tile_rows >= 128:
        tile_rows = (tile_rows // 128) * 128        # lane-dense output last dim
    else:
        tile_rows = max(8, (tile_rows // 8) * 8)    # sublane-aligned
    return tile_rows


def global_avg_pool_flatten(
    z_nchw: jax.Array,
    *,
    force_pallas: bool = False,
    min_pallas_bytes: int = 512 * 1024,
) -> jax.Array:
    """Pallas equivalent of BaseModel.flatten: (N, C, H, W) -> (N, C)."""
    n, c, h, w = z_nchw.shape
    hw = h * w
    r = n * c
    itemsize = jnp.dtype(z_nchw.dtype).itemsize

    # Tiny inputs: XLA's fused reduce beats kernel launch + per-step overhead.
    if not force_pallas and z_nchw.size * itemsize < min_pallas_bytes:
        return jnp.mean(z_nchw, axis=(2, 3))

    x = z_nchw.reshape(r, hw)                       # free row-major view

    tile_rows = _pick_tile_rows(r, hw * itemsize)
    num_tiles = pl.cdiv(r, tile_rows)
    r_pad = num_tiles * tile_rows
    if r_pad != r:
        x = jnp.pad(x, ((0, r_pad - r), (0, 0)))    # pad rows; extras sliced off

    kernel = functools.partial(_gap_rows_kernel, inv_hw=float(1.0 / hw))

    out_2d = pl.pallas_call(
        kernel,
        out_shape=jax.ShapeDtypeStruct((num_tiles, tile_rows), z_nchw.dtype),
        grid=(num_tiles,),
        in_specs=[pl.BlockSpec((tile_rows, hw), lambda i: (i, 0))],
        out_specs=pl.BlockSpec((1, tile_rows), lambda i: (i, 0)),
        compiler_params=pltpu.CompilerParams(
            dimension_semantics=("parallel",),       # megacore-shard rows (v7x)
            vmem_limit_bytes=32 * 1024 * 1024,       # explicit; safe on v5e..v7x
        ),
        cost_estimate=pl.CostEstimate(
            flops=r * hw,                            # spatial-sum adds
            transcendentals=0,
            bytes_accessed=r * hw * itemsize + r * itemsize,
        ),
    )(x)

    return out_2d.reshape(r_pad)[:r].reshape(n, c)


# ------------------------------ Module port ------------------------------- #
class BaseModelPallas:
    """JAX/Pallas port of BaseModel (abstract base; no learned parameters)."""

    def __init__(self, context_size: int = 5, len_traj_pred: int = 5,
                 learn_angle: bool = True) -> None:
        self.context_size = context_size
        self.learn_angle = learn_angle
        self.len_trajectory_pred = len_traj_pred
        self.num_action_params = 4 if learn_angle else 2

    def flatten(self, z: jax.Array, *, force_pallas: bool = False) -> jax.Array:
        return global_avg_pool_flatten(z, force_pallas=force_pallas)

    def forward(self, obs_img: jax.Array, goal_img: jax.Array):
        # TODO(synk): BaseModel.forward raises NotImplementedError in PyTorch
        # (abstract base class) — nothing to implement here.
        raise NotImplementedError


# --------------------------------- Demo ------------------------------------ #
if __name__ == "__main__":
    key = jax.random.PRNGKey(0)
    k1, k2 = jax.random.split(key)

    # Small shapes consistent with the module: batch=2, channels=4, spatial=16.
    obs_img = jax.random.normal(k1, (2, 4, 16, 16), dtype=jnp.float32)   # NCHW
    goal_img = jax.random.normal(k2, (2, 4, 16, 16), dtype=jnp.float32)  # NCHW

    model = BaseModelPallas(context_size=5, len_traj_pred=5, learn_angle=True)

    # Force the Pallas path so the kernel actually runs on these small inputs
    # (the wrapper would otherwise short-circuit KB-scale arrays to jnp.mean).
    out = model.flatten(obs_img, force_pallas=True)          # (2, 4)
    out = jax.block_until_ready(out)

    # Cross-check against plain-JAX reference of adaptive_avg_pool2d((1,1)).
    ref = jnp.mean(obs_img, axis=(2, 3))
    assert out.shape == (2, 4)
    assert jnp.allclose(out, ref, atol=1e-5, rtol=1e-5)

    # Auto path (short-circuit for tiny input) must agree as well.
    out_auto = jax.block_until_ready(model.flatten(goal_img))
    assert jnp.allclose(out_auto, jnp.mean(goal_img, axis=(2, 3)),
                        atol=1e-5, rtol=1e-5)

    print("KERNEL_OK")
</pallas_src>

<mosaic_0001>
module attributes {stable_mosaic.version = 11 : i64} {
  func.func @_gap_rows_kernel(%arg0: i32, %arg1: memref<8x256xf32, #tpu.memory_space<vmem>>, %arg2: memref<1x8xf32, #tpu.memory_space<vmem>>) attributes {dimension_semantics = [#tpu.dimension_semantics<parallel>], iteration_bounds = array<i64: 1>, scalar_prefetch = 0 : i64, scratch_operands = 0 : i64, tpu.core_type = #tpu.core_type<tc>, window_params = [{transform_indices = @transform_0, window_bounds = array<i64: 8, 256>}, {transform_indices = @transform_1, window_bounds = array<i64: 1, 8>}]} {
    %c0 = arith.constant 0 : index
    %c0_0 = arith.constant 0 : index
    %0 = vector.load %arg1[%c0, %c0_0] : memref<8x256xf32, #tpu.memory_space<vmem>>, vector<8x256xf32>
    %cst = arith.constant dense<0.000000e+00> : vector<8xf32>
    %1 = vector.multi_reduction <add>, %0, %cst [1] : vector<8x256xf32> to vector<8xf32>
    %cst_1 = arith.constant 3.906250e-03 : f32
    %2 = vector.broadcast %cst_1 : f32 to vector<8xf32>
    %3 = arith.mulf %1, %2 : vector<8xf32>
    %4 = vector.shape_cast %3 : vector<8xf32> to vector<1x8xf32>
    %c0_2 = arith.constant 0 : index
    %c0_3 = arith.constant 0 : index
    %5 = vector.load %arg2[%c0_2, %c0_3] : memref<1x8xf32, #tpu.memory_space<vmem>>, vector<1x8xf32>
    tpu.vector_store %arg2[%c0_2, %c0_3], %4 {strides = array<i32>} : memref<1x8xf32, #tpu.memory_space<vmem>>, vector<1x8xf32>,
    return
  }
  func.func @transform_0(%arg0: i32) -> (i32, i32) {
    %c0_i32 = arith.constant 0 : i32
    %c0_i32_0 = arith.constant 0 : i32
    return %arg0, %c0_i32 : i32, i32
  }
  func.func @transform_1(%arg0: i32) -> (i32, i32) {
    %c0_i32 = arith.constant 0 : i32
    %c0_i32_0 = arith.constant 0 : i32
    return %arg0, %c0_i32 : i32, i32
  }
}

</mosaic_0001>

<bundles_post_ra>
// kernel: tpu_custom_call.1
= control target key start
LH: loop header
LB: loop body
LE: loop exit
PB: predicated region body
PF: predicated region fallthrough
CT: control target
= control target key end

     0   :  { %6 = vsyncpa [#allocation3], 0  ;;  %s116_s0 = inlined_call_operand.hbm [shape: f32[8,256], index: 0, kind: input, shape index: {}]   ;;  %s117_s1 = inlined_call_operand.hbm [shape: f32[1,8], index: 1, kind: output, shape index: {}]  }
   0x1   :  { %7 = vsyncpa [#allocation4], 0  ;;  %s98_s6 = smov [#allocation2]  }
   0x2   :  { %s14_s7 = sshll.u32 %s98_s6, 4  ;;  %s15_s7 = int_to_ptr.vmem [resolvable:$true] %s14_s7 }
   0x3   :  { %s62_s8 = scalar_lea.vmem %s15_s7, 256  ;;  %p67_p1 = scmp.lt.s32.totalorder %s15_s7, %s15_s7 }
   0x4   :  { %p63_p0 = scmp.ne.s32.totalorder %s15_s7, %s62_s8  ;;  %p68_p2 = scmp.lt.s32.totalorder %s62_s8, %s62_s8 }
   0x6   :  { %p69_p3 = por %p68_p2, %p67_p1 }
   0x8   :  { %p70_p4 = pnand %p69_p3, %p63_p0 }
   0xa   :  { %73 = shalt.err (!%p70_p4)
}
   0xb   :  { %17 = dma.hbm_to_vmem [thread:$0]  %s116_s0, 256, %s15_s7, [#allocation3]  }
   0xc   :  { %94 = dma.done.wait [#allocation3], 256  }
   0xd   :  { %95 = vsyncadd [#allocation3], 4294967040  ;;  %v21_v0 = vld [vmem:[#allocation2] sm:$0xff]  ;;  %v22_v1 = vld [vmem:[#allocation2 + $0x8] sm:$0xff]  ;;  %v28_v3 = vlaneseq  ;;  %s99_s11 = smov [#allocation5]   ;;  %vm35_vm0 = vcmask 57344  }
   0xe   :  { %v23_v2 = vadd.f32 %v22_v1, %v21_v0  ;;  %s43_s12 = sshll.u32 %s99_s11, 4  ;;  %s44_s12 = int_to_ptr.vmem [resolvable:$true] %s43_s12 }
   0xf   :  { %v29_v4 = vand.u32 127, %v28_v3  ;;  %v31_v5 = vshrl.u32 %v28_v3, 7  ;;  %s74_s13 = scalar_lea.vmem %s44_s12, 16  ;;  %s78_s0 = scalar_lea.vmem %s44_s12, 32 }
  0x10   :  { %24 = vadd.xlane.f32.xlu0 %v23_v2  ;;  %p75_p5 = scmp.ne.s32.totalorder %s44_s12, %s74_s13  ;;  %p79_p6 = scmp.lt.s32.totalorder %s44_s12, %s44_s12 }
  0x11   :  { %v32_v6 = vsub.s32 %v29_v4, %v31_v5  ;;  %p80_p7 = scmp.lt.s32.totalorder %s78_s0, %s74_s13 }
  0x13   :  { %p81_p8 = por %p80_p7, %p79_p6 }
  0x15   :  { %p82_p9 = pnand %p81_p8, %p75_p5 }
  0x99   :  { %v25_v7 = vpop.xlane.xlu0 %24 }
  0x9a   :  { %v26_v8 = vmul.f32 0.00390625, %v25_v7 }
  0x9c   :  { %v33_v9 = vrot.slane %v26_v8, %v32_v6 }
  0x9e   :  { %36 = vst.msk [vmem:[#allocation5] sm:$0x1] %vm35_vm0, %v33_v9 }
  0x9f   :  { %85 = shalt.err (!%p82_p9)
}
  0xa0   :  { %46 = dma.vmem_to_hbm [thread:$0]  %s44_s12, 16, %s117_s1, [#allocation4]  }
  0xa1   :  { %96 = dma.done.wait [#allocation4], 16  }
  0xa2   :  { %97 = vsyncadd [#allocation4], 4294967280 }
  0xa3   :  { %50 = vsyncpa [#allocation3], 1 }
  0xa4   :  { %51 = vsyncpa [#allocation4], 1 }

</bundles_post_ra>
